<compile_context>
chip_gen: v7x
topology: tpu7x:2x2x1
jax: 0.10.0
libtpu: 0.0.40
codegen_flags: <defaults>
</compile_context>

<pallas_src>
import functools

import numpy as np
import jax
import jax.numpy as jnp
from jax.experimental import pallas as pl
from jax.experimental.pallas import tpu as pltpu

# Matmul operand dtype (accumulation is always f32 on the MXU).
COMPUTE_DTYPE = jnp.bfloat16


def _round_up(x, m):
    return ((x + m - 1) // m) * m


def _pad2d(x, rows, cols):
    r, c = x.shape
    if r == rows and c == cols:
        return x
    return jnp.pad(x, ((0, rows - r), (0, cols - c)))


def _adj_pad(n):
    """Adjacency dim padding: multiples of 512 on large graphs (gives the tile
    chooser >=512-wide divisors at <512/n relative waste), 128 on small ones."""
    return _round_up(n, 512 if n >= 2048 else 128)


@functools.lru_cache(maxsize=None)
def _tensorcores_per_chip():
    """2 on v7x (its two TensorCores split 'parallel' grid axes); 1 on v5e/v6e.
    Defaults to 1 if the device kind cannot be determined."""
    try:
        kind = (jax.devices()[0].device_kind or "").lower()
    except Exception:
        return 1
    return 2 if ("v7" in kind or "tpu7" in kind) else 1


def _choose_tile(padded, pref, align, min_blocks=1):
    """Largest tile that is a multiple of `align`, divides `padded` (itself a
    multiple of `align`), is <= `pref`, and — when possible — leaves at least
    `min_blocks` blocks along the axis (so v7x shards it across 2 TCs).
    Never introduces extra padding (avoids zero-streaming and avoids copying
    pre-padded adjacency operands)."""
    cap = max(align, (min(pref, padded) // align) * align)
    if min_blocks > 1:
        cap = min(cap, max(align, (padded // (align * min_blocks)) * align))
    t = cap
    while t > align and padded % t:
        t -= align
    return t


# ---------------------------------------------------------------------------
# Generic tiled matmul kernel (optionally fused SiLU + row L2-normalize epilogue)
# ---------------------------------------------------------------------------

def _mm_kernel(a_ref, b_ref, o_ref, acc_ref, *, apply_silu_l2norm):
    @pl.when(pl.program_id(2) == 0)
    def _init():
        acc_ref[...] = jnp.zeros_like(acc_ref)

    acc_ref[...] += jnp.dot(a_ref[...], b_ref[...],
                            preferred_element_type=jnp.float32)

    @pl.when(pl.program_id(2) == pl.num_programs(2) - 1)
    def _finalize():
        acc = acc_ref[...]
        if apply_silu_l2norm:
            # SiLU(x) = x * sigmoid(x); sigmoid via EUP exp + approx reciprocal.
            y = acc * pl.reciprocal(1.0 + jnp.exp(-acc), approx=True)
            # F.normalize(p=2, dim=1, eps=1e-12); padded cols are exactly zero.
            ssq = jnp.sum(y * y, axis=1, keepdims=True)
            acc = y * jax.lax.rsqrt(jnp.maximum(ssq, 1e-24))
        o_ref[...] = acc.astype(o_ref.dtype)


def pallas_matmul(a, b, *, silu_l2norm=False, out_dtype=jnp.float32,
                  out_rows=None, out_cols=None,
                  tm_pref=512, tk_pref=1024, tn_pref=512, min_m_blocks=1):
    """out = a @ b with f32 MXU accumulation; optional fused SiLU + row-L2-norm.

    Operands already stored in COMPUTE_DTYPE at aligned shapes (pre-prepared
    adjacencies / weights) pass straight through: astype / pad become no-ops.
    `a` may carry extra zero padding columns relative to `b`'s logical rows.
    """
    M, K_a = a.shape
    K_b, N = b.shape
    assert K_a >= K_b, (a.shape, b.shape)

    Mp = _round_up(M, 8)
    Kp = _round_up(max(K_a, K_b), 128)
    Npad = _round_up(N, 128)

    tm = _choose_tile(Mp, tm_pref, 8, min_m_blocks)
    tk = _choose_tile(Kp, tk_pref, 128)
    tn = Npad if silu_l2norm else _choose_tile(Npad, tn_pref, 128)

    a_p = _pad2d(a.astype(COMPUTE_DTYPE), Mp, Kp)
    b_p = _pad2d(b.astype(COMPUTE_DTYPE), Kp, Npad)

    grid = (Mp // tm, Npad // tn, Kp // tk)
    kernel = functools.partial(_mm_kernel, apply_silu_l2norm=silu_l2norm)

    out = pl.pallas_call(
        kernel,
        out_shape=jax.ShapeDtypeStruct((Mp, Npad), out_dtype),
        grid_spec=pltpu.PrefetchScalarGridSpec(
            num_scalar_prefetch=0,
            grid=grid,
            in_specs=[pl.BlockSpec((tm, tk), lambda i, j, k: (i, k)),
                      pl.BlockSpec((tk, tn), lambda i, j, k: (k, j))],
            out_specs=pl.BlockSpec((tm, tn), lambda i, j, k: (i, j)),
            scratch_shapes=[pltpu.VMEM((tm, tn), jnp.float32)],
        ),
        compiler_params=pltpu.CompilerParams(
            dimension_semantics=("parallel", "parallel", "arbitrary")),
    )(a_p, b_p)

    out_rows = M if out_rows is None else out_rows
    out_cols = N if out_cols is None else out_cols
    return out[:out_rows, :out_cols]


# ---------------------------------------------------------------------------
# Elementwise fused SiLU + row-L2-normalize (used for the 2-relation 'stack'
# concat of the author node type; zero-padded columns are inert in the norm).
# ---------------------------------------------------------------------------

def _silu_l2norm_kernel(x_ref, o_ref):
    x = x_ref[...].astype(jnp.float32)
    y = x * pl.reciprocal(1.0 + jnp.exp(-x), approx=True)
    ssq = jnp.sum(y * y, axis=1, keepdims=True)
    o_ref[...] = (y * jax.lax.rsqrt(jnp.maximum(ssq, 1e-24))).astype(o_ref.dtype)


def silu_l2norm_rows(x, *, out_dtype=jnp.float32, rows_pref=512):
    N, D = x.shape
    Npad = _round_up(N, 8)
    Dp = _round_up(D, 128)
    tn = _choose_tile(Npad, rows_pref, 8)
    x_p = _pad2d(x.astype(jnp.float32), Npad, Dp)
    out = pl.pallas_call(
        _silu_l2norm_kernel,
        out_shape=jax.ShapeDtypeStruct((Npad, Dp), out_dtype),
        grid=(Npad // tn,),
        in_specs=[pl.BlockSpec((tn, Dp), lambda i: (i, 0))],
        out_specs=pl.BlockSpec((tn, Dp), lambda i: (i, 0)),
        compiler_params=pltpu.CompilerParams(dimension_semantics=("parallel",)),
    )(x_p)
    return out[:N, :D]


# ---------------------------------------------------------------------------
# Edge scores:  || h[src] - h[dst] ||_2 , feature-major layout so the output is a
# lane-dense (1, E) slab instead of a (E, 1) masked-store column.
# ---------------------------------------------------------------------------

def _edge_l2_kernel(hs_ref, hd_ref, out_ref):
    d = hs_ref[...] - hd_ref[...]
    out_ref[...] = jnp.sqrt(jnp.sum(d * d, axis=0, keepdims=True))


def edge_l2_scores(h, src_idx, dst_idx, *, lanes_pref=512):
    E = src_idx.shape[0]
    D = h.shape[1]
    Dp = _round_up(D, 8)
    Ep = _round_up(E, 128)
    te = _choose_tile(Ep, lanes_pref, 128)
    # Gather + transpose in the wrapper (layout plumbing, keeps the store lane-dense).
    hs = _pad2d(h[src_idx].astype(jnp.float32).T, Dp, Ep)
    hd = _pad2d(h[dst_idx].astype(jnp.float32).T, Dp, Ep)
    out = pl.pallas_call(
        _edge_l2_kernel,
        out_shape=jax.ShapeDtypeStruct((1, Ep), jnp.float32),
        grid=(Ep // te,),
        in_specs=[pl.BlockSpec((Dp, te), lambda i: (0, i)),
                  pl.BlockSpec((Dp, te), lambda i: (0, i))],
        out_specs=pl.BlockSpec((1, te), lambda i: (0, i)),
        compiler_params=pltpu.CompilerParams(dimension_semantics=("parallel",)),
    )(hs, hd)
    return out[0, :E]


# ---------------------------------------------------------------------------
# One-time preparation (all per-graph / per-parameter casts, pads and concats of
# the big operands live here, NOT on the per-forward path)
# ---------------------------------------------------------------------------

def prepare_params(params):
    return {
        "emb_paper": params["emb_paper"],
        "emb_author": params["emb_author"],
        # Three paper-source conv1 projections fused into one weight matrix.
        "W1_paper_cat": jnp.concatenate(
            [params["W1_paper_selfloop"], params["W1_writtenby"],
             params["W1_publishedin"]], axis=1).astype(COMPUTE_DTYPE),
        "W1_author_selfloop": params["W1_author_selfloop"].astype(COMPUTE_DTYPE),
        "W2_publishedin_rev": params["W2_publishedin_rev"].astype(COMPUTE_DTYPE),
        "W2_writtenby_rev": params["W2_writtenby_rev"].astype(COMPUTE_DTYPE),
    }


def prepare_graphs(graphs):
    Np = graphs["A1_paper_selfloop"].shape[0]
    Na = graphs["A1_author_selfloop"].shape[0]
    Nv = graphs["A1_publishedin"].shape[0]
    Np_p, Na_p, Nv_p = _adj_pad(Np), _adj_pad(Na), _adj_pad(Nv)

    def prep(A, rows, cols):
        return _pad2d(A.astype(COMPUTE_DTYPE), rows, cols)

    return {
        "sizes": (Np, Na, Nv),
        "sections": (Np_p, Nv_p, Na_p),          # column sections of A2_cat
        "A1_paper_selfloop": prep(graphs["A1_paper_selfloop"], Np_p, Np_p),
        "A1_author_selfloop": prep(graphs["A1_author_selfloop"], Na_p, Na_p),
        "A1_writtenby": prep(graphs["A1_writtenby"], Na_p, Np_p),
        "A1_publishedin": prep(graphs["A1_publishedin"], Nv_p, Np_p),
        # conv2 is a SUM aggregate -> all three relations fused into one matmul
        # against [H_paper ; Z_venue ; Z_author]; concat built once here.
        "A2_cat": jnp.concatenate(
            [prep(graphs["A2_paper_selfloop"], Np_p, Np_p),
             prep(graphs["A2_publishedin_rev"], Np_p, Nv_p),
             prep(graphs["A2_writtenby_rev"], Np_p, Na_p)], axis=1),
        "pos_src": graphs["pos_src"], "pos_dst": graphs["pos_dst"],
        "neg_src": graphs["neg_src"], "neg_dst": graphs["neg_dst"],
    }


# ---------------------------------------------------------------------------
# Model forward (expects prepared params / graphs)
# ---------------------------------------------------------------------------

def batch_model_forward(params, graphs, inputs, input_weights, bert_embedding):
    """BatchModel.forward(pos_g, neg_g, blocks, inputs, input_weights, degree_scalar=None)."""
    Np, Na, Nv = graphs["sizes"]
    Np_k, Nv_k, Na_k = graphs["sections"]
    D1 = params["W1_author_selfloop"].shape[1]          # hidden / out feature size
    mb = 2 if _tensorcores_per_chip() >= 2 else 1       # >=2 M blocks on v7x

    # ---- input feature construction (tiny; XLA glue + einsum) ----------------
    paper_tax = params["emb_paper"][inputs["paper"]].sum(axis=1)               # (Np, 32)
    x_paper = jnp.concatenate([paper_tax, bert_embedding.astype(jnp.float32)],
                              axis=1).astype(COMPUTE_DTYPE)                    # (Np, 160)
    x_author = jnp.einsum("ntd,nt->nd",
                          params["emb_author"][inputs["author"]],
                          input_weights["author"]).astype(COMPUTE_DTYPE)       # (Na, 32)

    # ---- conv1 projections (project-then-aggregate; 3 paper W's in one matmul)
    z_paper = pallas_matmul(x_paper, params["W1_paper_cat"],
                            out_dtype=COMPUTE_DTYPE)                           # (Np, 96)
    z_ps = z_paper[:, 0 * D1:1 * D1]
    z_wb = z_paper[:, 1 * D1:2 * D1]
    z_pub = z_paper[:, 2 * D1:3 * D1]
    z_as = pallas_matmul(x_author, params["W1_author_selfloop"],
                         out_dtype=COMPUTE_DTYPE)                              # (Na, 32)

    # ---- conv1 aggregations (+ fused SiLU / row-L2-normalize epilogues) ------
    h_paper = pallas_matmul(graphs["A1_paper_selfloop"], z_ps,
                            silu_l2norm=True, out_dtype=COMPUTE_DTYPE,
                            out_rows=Np, out_cols=D1, min_m_blocks=mb)         # (Np, 32)
    h_venue = pallas_matmul(graphs["A1_publishedin"], z_pub,
                            silu_l2norm=True, out_dtype=COMPUTE_DTYPE,
                            out_rows=Nv, out_cols=D1, min_m_blocks=mb)         # (Nv, 32)
    # 'stack' aggregation for authors == feature concat of the two relations:
    # two plain aggregations + a tiny elementwise SiLU+L2 kernel (no zero blocks).
    y_as = pallas_matmul(graphs["A1_author_selfloop"], z_as,
                         out_rows=Na, out_cols=D1, min_m_blocks=mb)            # (Na, 32) f32
    y_wb = pallas_matmul(graphs["A1_writtenby"], z_wb,
                         out_rows=Na, out_cols=D1, min_m_blocks=mb)            # (Na, 32) f32
    h_author = silu_l2norm_rows(jnp.concatenate([y_as, y_wb], axis=1),
                                out_dtype=COMPUTE_DTYPE)                       # (Na, 64)

    # ---- conv2 (sum aggregate, dst='paper'): project, then one fused A_cat@Z --
    z2_venue = pallas_matmul(h_venue, params["W2_publishedin_rev"],
                             out_dtype=COMPUTE_DTYPE)                          # (Nv, 32)
    z2_author = pallas_matmul(h_author, params["W2_writtenby_rev"],
                              out_dtype=COMPUTE_DTYPE)                         # (Na, 32)
    Z2 = jnp.concatenate([_pad2d(h_paper, Np_k, D1),
                          _pad2d(z2_venue, Nv_k, D1),
                          _pad2d(z2_author, Na_k, D1)], axis=0)                # (Np_k+Nv_k+Na_k, 32)
    h_out = pallas_matmul(graphs["A2_cat"], Z2,
                          out_rows=Np, out_cols=D1, min_m_blocks=mb)           # (Np, 32) f32

    # ---- predictor ('citeby', u_sub_v then L2); pos & neg fused in one call ---
    E_pos = graphs["pos_src"].shape[0]
    all_src = jnp.concatenate([graphs["pos_src"], graphs["neg_src"]])
    all_dst = jnp.concatenate([graphs["pos_dst"], graphs["neg_dst"]])
    scores = edge_l2_scores(h_out, all_src, all_dst)
    pos, neg = scores[:E_pos], scores[E_pos:]
    reg_loss = 0.0                                                             # _lambda == 0
    return pos, neg, reg_loss


# ---------------------------------------------------------------------------
# Pure-JAX f32 reference
# ---------------------------------------------------------------------------

def reference_forward(params, graphs, inputs, input_weights, bert_embedding):
    paper_tax = params["emb_paper"][inputs["paper"]].sum(axis=1)
    x_paper = jnp.concatenate([paper_tax, bert_embedding], axis=1)
    x_author = (params["emb_author"][inputs["author"]]
                * input_weights["author"][:, :, None]).sum(axis=1)

    def gc(A, x, w=None):
        y = A @ x
        return y @ w if w is not None else y

    def nrm(v):
        y = v * jax.nn.sigmoid(v)
        return y / jnp.maximum(jnp.linalg.norm(y, axis=1, keepdims=True), 1e-12)

    h_paper = nrm(gc(graphs["A1_paper_selfloop"], x_paper, params["W1_paper_selfloop"]))
    h_author = nrm(jnp.concatenate(
        [gc(graphs["A1_author_selfloop"], x_author, params["W1_author_selfloop"]),
         gc(graphs["A1_writtenby"], x_paper, params["W1_writtenby"])], axis=1))
    h_venue = nrm(gc(graphs["A1_publishedin"], x_paper, params["W1_publishedin"]))

    h_out = (gc(graphs["A2_paper_selfloop"], h_paper)
             + gc(graphs["A2_publishedin_rev"], h_venue, params["W2_publishedin_rev"])
             + gc(graphs["A2_writtenby_rev"], h_author, params["W2_writtenby_rev"]))

    def score(s, d):
        return jnp.linalg.norm(h_out[s] - h_out[d], axis=1)

    return (score(graphs["pos_src"], graphs["pos_dst"]),
            score(graphs["neg_src"], graphs["neg_dst"]))


# ---------------------------------------------------------------------------
# main
# ---------------------------------------------------------------------------

def dense_adj(n_dst, n_src, dst_idx, src_idx, norm):
    A = jnp.zeros((n_dst, n_src), jnp.float32)
    A = A.at[jnp.asarray(dst_idx), jnp.asarray(src_idx)].add(1.0)
    if norm == "mean":
        deg = jnp.maximum(jnp.sum(A, axis=1, keepdims=True), 1.0)
        A = A / deg
    return A


if __name__ == "__main__":
    key = jax.random.PRNGKey(0)
    Np, Na, Nv = 16, 12, 4                # papers / authors / venues
    D_EMB, D_HID, D_OUT = 32, 32, 32      # node_embedding_size / hidden / out features
    BERT_SYN = 128                        # synthetic stand-in for BERT_VEC_LENS=768
    NT_PAPER, NT_AUTHOR = 20, 10          # taxon vocab sizes (last row = padding)
    T_PAPER, T_AUTHOR = 4, 3              # taxons per node
    E_POS, E_NEG = 10, 10

    ks = jax.random.split(key, 12)

    # ---- deterministic parameters ----
    emb_paper = (0.1 * jax.random.normal(ks[0], (NT_PAPER + 1, D_EMB))).at[-1].set(0.0)
    emb_author = (0.1 * jax.random.normal(ks[1], (NT_AUTHOR + 1, D_EMB))).at[-1].set(0.0)
    d_in_paper = BERT_SYN + D_EMB
    params = {
        "emb_paper": emb_paper,
        "emb_author": emb_author,
        "W1_paper_selfloop": jax.random.normal(ks[2], (d_in_paper, D_OUT)) / np.sqrt(d_in_paper),
        "W1_author_selfloop": jax.random.normal(ks[3], (D_EMB, D_HID)) / np.sqrt(D_EMB),
        "W1_writtenby": jax.random.normal(ks[4], (d_in_paper, D_HID)) / np.sqrt(d_in_paper),
        "W1_publishedin": jax.random.normal(ks[5], (d_in_paper, D_HID)) / np.sqrt(d_in_paper),
        "W2_publishedin_rev": jax.random.normal(ks[6], (D_HID, D_OUT)) / np.sqrt(D_HID),
        "W2_writtenby_rev": jax.random.normal(ks[7], (2 * D_HID, D_OUT)) / np.sqrt(2 * D_HID),
    }

    # ---- deterministic synthetic graph (dense normalized adjacencies) ----
    pi = np.arange(Np)
    wb_dst = np.concatenate([pi % Na, (2 * pi + 3) % Na])          # writtenby: paper -> author
    wb_src = np.concatenate([pi, pi])
    pub_dst, pub_src = pi % Nv, pi                                  # publishedin: paper -> venue
    graphs = {
        "A1_paper_selfloop": dense_adj(Np, Np, pi, pi, "sum"),
        "A1_author_selfloop": dense_adj(Na, Na, np.arange(Na), np.arange(Na), "sum"),
        "A1_writtenby": dense_adj(Na, Np, wb_dst, wb_src, "mean"),
        "A1_publishedin": dense_adj(Nv, Np, pub_dst, pub_src, "mean"),
        "A2_paper_selfloop": dense_adj(Np, Np, pi, pi, "mean"),
        "A2_publishedin_rev": dense_adj(Np, Nv, pub_src, pub_dst, "mean"),
        "A2_writtenby_rev": dense_adj(Np, Na, wb_src, wb_dst, "mean"),
        "pos_src": jnp.asarray(np.arange(E_POS) % Np, jnp.int32),
        "pos_dst": jnp.asarray((np.arange(E_POS) * 3 + 1) % Np, jnp.int32),
        "neg_src": jax.random.randint(ks[8], (E_NEG,), 0, Np),
        "neg_dst": jax.random.randint(ks[9], (E_NEG,), 0, Np),
    }

    # ---- deterministic inputs ----
    inputs = {
        "paper": jax.random.randint(ks[10], (Np, T_PAPER), 0, NT_PAPER + 1),
        "author": jax.random.randint(ks[11], (Na, T_AUTHOR), 0, NT_AUTHOR + 1),
    }
    input_weights = {"author": jax.random.uniform(jax.random.PRNGKey(123), (Na, T_AUTHOR))}
    bert_embedding = jax.random.normal(jax.random.PRNGKey(7), (Np, BERT_SYN))

    # ---- one-time prep (bf16 + padded adjacencies / weights, fused concats) ----
    params_p = prepare_params(params)
    graphs_p = prepare_graphs(graphs)
    graphs_p = jax.tree_util.tree_map(
        lambda x: jax.block_until_ready(x) if isinstance(x, jax.Array) else x, graphs_p)

    # ---- run Pallas model ----
    pos, neg, reg = batch_model_forward(params_p, graphs_p, inputs, input_weights, bert_embedding)
    pos, neg = jax.block_until_ready(pos), jax.block_until_ready(neg)

    # ---- correctness check against pure-JAX f32 reference ----
    # bf16 operands + bf16 intermediate storage (f32 MXU accumulation) shift rounding
    # vs. the f32 reference; with COMPUTE_DTYPE = float32 the tight tolerance holds.
    if COMPUTE_DTYPE == jnp.bfloat16:
        rtol, atol = 5e-2, 1e-2
    else:
        rtol, atol = 1e-3, 1e-4
    ref_pos, ref_neg = reference_forward(params, graphs, inputs, input_weights, bert_embedding)
    assert np.allclose(np.asarray(pos), np.asarray(ref_pos), rtol=rtol, atol=atol), "pos mismatch"
    assert np.allclose(np.asarray(neg), np.asarray(ref_neg), rtol=rtol, atol=atol), "neg mismatch"
    assert reg == 0.0

    print("KERNEL_OK")
</pallas_src>

<mosaic_0001>
module attributes {stable_mosaic.version = 11 : i64} {
  func.func @_mm_kernel(%arg0: i32, %arg1: i32, %arg2: i32, %arg3: memref<16x256xbf16, #tpu.memory_space<vmem>>, %arg4: memref<256x128xbf16, #tpu.memory_space<vmem>>, %arg5: memref<16x128xbf16, #tpu.memory_space<vmem>>, %arg6: memref<16x128xf32, #tpu.memory_space<vmem>>) attributes {dimension_semantics = [#tpu.dimension_semantics<parallel>, #tpu.dimension_semantics<parallel>, #tpu.dimension_semantics<arbitrary>], iteration_bounds = array<i64: 1, 1, 1>, scalar_prefetch = 0 : i64, scratch_operands = 1 : i64, tpu.core_type = #tpu.core_type<tc>, window_params = [{transform_indices = @transform_0, window_bounds = array<i64: 16, 256>}, {transform_indices = @transform_1, window_bounds = array<i64: 256, 128>}, {transform_indices = @transform_2, window_bounds = array<i64: 16, 128>}]} {
    %c0_i32 = arith.constant 0 : i32
    %0 = arith.cmpi eq, %arg2, %c0_i32 : i32
    %1 = arith.extui %0 : i1 to i32
    %c0_i32_0 = arith.constant 0 : i32
    %2 = arith.cmpi ne, %1, %c0_i32_0 : i32
    scf.if %2 {
      %cst_10 = arith.constant 0.000000e+00 : f32
      %12 = vector.broadcast %cst_10 : f32 to vector<16x128xf32>
      %c0_11 = arith.constant 0 : index
      %c0_12 = arith.constant 0 : index
      %13 = vector.load %arg6[%c0_11, %c0_12] : memref<16x128xf32, #tpu.memory_space<vmem>>, vector<16x128xf32>
      tpu.vector_store %arg6[%c0_11, %c0_12], %12 {strides = array<i32>} : memref<16x128xf32, #tpu.memory_space<vmem>>, vector<16x128xf32>,
    } else {
    }
    %c0 = arith.constant 0 : index
    %c0_1 = arith.constant 0 : index
    %3 = vector.load %arg6[%c0, %c0_1] : memref<16x128xf32, #tpu.memory_space<vmem>>, vector<16x128xf32>
    %c0_2 = arith.constant 0 : index
    %c0_3 = arith.constant 0 : index
    %4 = vector.load %arg3[%c0_2, %c0_3] : memref<16x256xbf16, #tpu.memory_space<vmem>>, vector<16x256xbf16>
    %c0_4 = arith.constant 0 : index
    %c0_5 = arith.constant 0 : index
    %5 = vector.load %arg4[%c0_4, %c0_5] : memref<256x128xbf16, #tpu.memory_space<vmem>>, vector<256x128xbf16>
    %cst = arith.constant dense<0.000000e+00> : vector<16x128xf32>
    %6 = tpu.matmul %4, %5, %cst {dimension_numbers = #tpu.dot_dimension_numbers<[1], [0], [0], [1], [0, 0, 1, 1], [], []>} : vector<16x256xbf16>, vector<256x128xbf16>, vector<16x128xf32> -> vector<16x128xf32>
    %7 = arith.addf %3, %6 : vector<16x128xf32>
    %c0_6 = arith.constant 0 : index
    %c0_7 = arith.constant 0 : index
    %8 = vector.load %arg6[%c0_6, %c0_7] : memref<16x128xf32, #tpu.memory_space<vmem>>, vector<16x128xf32>
    tpu.vector_store %arg6[%c0_6, %c0_7], %7 {strides = array<i32>} : memref<16x128xf32, #tpu.memory_space<vmem>>, vector<16x128xf32>,
    %c0_i32_8 = arith.constant 0 : i32
    %9 = arith.cmpi eq, %arg2, %c0_i32_8 : i32
    %10 = arith.extui %9 : i1 to i32
    %c0_i32_9 = arith.constant 0 : i32
    %11 = arith.cmpi ne, %10, %c0_i32_9 : i32
    scf.if %11 {
      %c0_10 = arith.constant 0 : index
      %c0_11 = arith.constant 0 : index
      %12 = vector.load %arg6[%c0_10, %c0_11] : memref<16x128xf32, #tpu.memory_space<vmem>>, vector<16x128xf32>
      %13 = arith.truncf %12 : vector<16x128xf32> to vector<16x128xbf16>
      %c0_12 = arith.constant 0 : index
      %c0_13 = arith.constant 0 : index
      %14 = vector.load %arg5[%c0_12, %c0_13] : memref<16x128xbf16, #tpu.memory_space<vmem>>, vector<16x128xbf16>
      tpu.vector_store %arg5[%c0_12, %c0_13], %13 {strides = array<i32>} : memref<16x128xbf16, #tpu.memory_space<vmem>>, vector<16x128xbf16>,
    } else {
    }
    return
  }
  func.func @transform_0(%arg0: i32, %arg1: i32, %arg2: i32) -> (i32, i32) {
    %c0_i32 = arith.constant 0 : i32
    return %arg0, %arg2 : i32, i32
  }
  func.func @transform_1(%arg0: i32, %arg1: i32, %arg2: i32) -> (i32, i32) {
    %c0_i32 = arith.constant 0 : i32
    return %arg2, %arg1 : i32, i32
  }
  func.func @transform_2(%arg0: i32, %arg1: i32, %arg2: i32) -> (i32, i32) {
    %c0_i32 = arith.constant 0 : i32
    return %arg0, %arg1 : i32, i32
  }
}

</mosaic_0001>

<bundles_post_ra>
// kernel: tpu_custom_call.1
= control target key start
LH: loop header
LB: loop body
LE: loop exit
PB: predicated region body
PF: predicated region fallthrough
CT: control target
= control target key end

     0   :  { %7 = vsyncpa [#allocation4], 0  ;;  %s478_s0 = inlined_call_operand.hbm [shape: bf16[16,256], index: 0, kind: input, shape index: {}]   ;;  %s479_s1 = inlined_call_operand.hbm [shape: bf16[256,128], index: 1, kind: input, shape index: {}]   ;;  %s480_s2 = inlined_call_operand.hbm [shape: bf16[16,128], index: 2, kind: output, shape index: {}]  }
   0x1   :  { %8 = vsyncpa [#allocation7], 0 }
   0x2   :  { %9 = vsyncpa [#allocation5], 0  ;;  %s414_s9 = smov [#allocation3]   ;;  %s342_s13 = scalar_lea.hbm %s478_s0, 256 }
   0x3   :  { %s15_s10 = sshll.u32 %s414_s9, 4  ;;  %p343_p0 = scmp.ne.s32.totalorder %s478_s0, %s342_s13  ;;  %s16_s10 = int_to_ptr.vmem [resolvable:$true] %s15_s10 }
   0x4   :  { %p346_p1 = scmp.lt.u32.totalorder %s342_s13, %s478_s0 }
   0x6   :  { %p348_p2 = pnand %p346_p1, %p343_p0 }
   0x8   :  { %351 = shalt.err (!%p348_p2)
}
   0x9   :  { %s352_s18 = scalar_lea.vmem %s16_s10, 256  ;;  %p357_p4 = scmp.lt.s32.totalorder %s16_s10, %s16_s10 }
   0xa   :  { %p353_p3 = scmp.ne.s32.totalorder %s16_s10, %s352_s18  ;;  %p358_p5 = scmp.lt.s32.totalorder %s352_s18, %s352_s18 }
   0xc   :  { %p359_p6 = por %p358_p5, %p357_p4 }
   0xe   :  { %p360_p7 = pnand %p359_p6, %p353_p3 }
  0x10   :  { %363 = shalt.err (!%p360_p7)
}
  0x11   :  { %s415_s19 = smov 128   ;;  %s416_s20 = smov 8  }
  0x12   :  { %21 = dma.hbm_to_vmem [thread:$0]  %s478_s0, 256, %s16_s10, [#allocation4], %s415_s19, %s415_s19, %s416_s20  }
  0x13   :  { %s417_s23 = smov [#allocation6]   ;;  %s364_s27 = scalar_lea.hbm %s479_s1, 2048 }
  0x14   :  { %s27_s24 = sshll.u32 %s417_s23, 4  ;;  %p365_p8 = scmp.ne.s32.totalorder %s479_s1, %s364_s27  ;;  %s28_s24 = int_to_ptr.vmem [resolvable:$true] %s27_s24 }
  0x15   :  { %p368_p9 = scmp.lt.u32.totalorder %s364_s27, %s479_s1 }
  0x17   :  { %p370_p10 = pnand %p368_p9, %p365_p8 }
  0x19   :  { %373 = shalt.err (!%p370_p10)
}
  0x1a   :  { %s374_s4 = scalar_lea.vmem %s28_s24, 2048  ;;  %p379_p12 = scmp.lt.s32.totalorder %s28_s24, %s28_s24 }
  0x1b   :  { %p375_p11 = scmp.ne.s32.totalorder %s28_s24, %s374_s4  ;;  %p380_p13 = scmp.lt.s32.totalorder %s374_s4, %s374_s4 }
  0x1d   :  { %p381_p0 = por %p380_p13, %p379_p12 }
  0x1f   :  { %p382_p1 = pnand %p381_p0, %p375_p11 }
  0x21   :  { %385 = shalt.err (!%p382_p1)
}
  0x22   :  { %s418_s0 = smov 64   ;;  %s419_s5 = smov 4  }
  0x23   :  { %33 = dma.hbm_to_vmem [thread:$0]  %s479_s1, 2048, %s28_s24, [#allocation7], %s418_s0, %s418_s0, %s419_s5  }
  0x24   :  { %408 = dma.done.wait [#allocation4], 256  }
  0x25   :  { %409 = vsyncadd [#allocation4], 4294967040 }
  0x26   :  { %410 = dma.done.wait [#allocation7], 2048  }
  0x27   :  { %411 = vsyncadd [#allocation7], 4294965248  ;;  %v323_v0 = vld [vmem:[#allocation6 + $0x40] sm:$0xff]   ;;  %v325_v2 = vld [vmem:[#allocation6 + $0x48] sm:$0xff]   ;;  %s420_s1 = smov [#allocation8]  }
  0x28   :  { %v324_v1 = vld [vmem:[#allocation6] sm:$0xff]   ;;  %294 = vmatprep.subr.bf16.mxu0 %v323_v0  ;;  %v326_v3 = vld [vmem:[#allocation6 + $0x8] sm:$0xff]   ;;  %v327_v4 = vld [vmem:[#allocation6 + $0x50] sm:$0xff]   ;;  %s254_s8 = sshll.u32 %s420_s1, 4  ;;  %s255_s8 = int_to_ptr.vmem [resolvable:$true] %s254_s8 }
  0x29   :  { %295 = vmatpush3.bf16.msra.mxu0 %v324_v1  ;;  %v328_v5 = vld [vmem:[#allocation6 + $0x10] sm:$0xff]   ;;  %v329_v6 = vld [vmem:[#allocation6 + $0x58] sm:$0xff]   ;;  %v331_v8 = vld [vmem:[#allocation6 + $0x60] sm:$0xff]   ;;  %s386_s9 = scalar_lea.vmem %s255_s8, 128  ;;  %p391_p3 = scmp.lt.s32.totalorder %s255_s8, %s255_s8 }
  0x2a   :  { %296 = vmatprep.subr.bf16.mxu0 %v325_v2  ;;  %v330_v7 = vld [vmem:[#allocation6 + $0x18] sm:$0xff]   ;;  %v332_v9 = vld [vmem:[#allocation6 + $0x20] sm:$0xff]   ;;  %v333_v10 = vld [vmem:[#allocation6 + $0x68] sm:$0xff]   ;;  %p387_p2 = scmp.ne.s32.totalorder %s255_s8, %s386_s9  ;;  %p392_p4 = scmp.lt.s32.totalorder %s386_s9, %s386_s9 }
  0x2b   :  { %v341_v11 = vld [vmem:[#allocation3 + $0x4] ss:$8 sps:$4 sm:$0xff]   ;;  %v334_v12 = vld [vmem:[#allocation6 + $0x28] sm:$0xff]   ;;  %v339_v17 = vld [vmem:[#allocation3] ss:$8 sps:$4 sm:$0xff]  }
  0x2c   :  { %221 = vmatprep.mubr.bf16.mxu0 %v341_v11  ;;  %v335_v13 = vld [vmem:[#allocation6 + $0x70] sm:$0xff]   ;;  %v337_v15 = vld [vmem:[#allocation6 + $0x78] sm:$0xff]   ;;  %p393_p5 = por %p392_p4, %p391_p3 }
  0x2d   :  { %297 = vmatpush3.bf16.msra.mxu0 %v326_v3  ;;  %v336_v14 = vld [vmem:[#allocation6 + $0x30] sm:$0xff]   ;;  %v338_v16 = vld [vmem:[#allocation6 + $0x38] sm:$0xff]  }
  0x2e   :  { %298 = vmatprep.subr.bf16.mxu0 %v327_v4  ;;  %p394_p6 = pnand %p393_p5, %p387_p2 }
  0x31   :  { %299 = vmatpush3.bf16.msra.mxu0 %v328_v5 }
  0x32   :  { %300 = vmatprep.subr.bf16.mxu0 %v329_v6 }
  0x35   :  { %301 = vmatpush3.bf16.msra.mxu0 %v330_v7 }
  0x36   :  { %302 = vmatprep.subr.bf16.mxu0 %v331_v8 }
  0x39   :  { %303 = vmatpush3.bf16.msra.mxu0 %v332_v9 }
  0x3a   :  { %304 = vmatprep.subr.bf16.mxu0 %v333_v10 }
  0x3d   :  { %305 = vmatpush3.bf16.msra.mxu0 %v334_v12 }
  0x3e   :  { %306 = vmatprep.subr.bf16.mxu0 %v335_v13 }
  0x41   :  { %307 = vmatpush3.bf16.msra.mxu0 %v336_v14 }
  0x42   :  { %308 = vmatprep.subr.bf16.mxu0 %v337_v15 }
  0x45   :  { %309 = vmatpush3.bf16.msra.mxu0 %v338_v16 }
  0x48   :  { %222 = vmatmul.mubr.bf16.vlgmr.msra.gmra.mrb[0].mxu0 %v339_v17 }
 0x11b   :  { %v310_v18 = vpop.f32.mrb[0].mxu0 }
 0x11c   :  { %v311_v19 = vpop.f32.mrb[1].mxu0 }
 0x11d   :  { %v312_v20 = vadd.f32 %v311_v19, %v310_v18  ;;  %v313_v21 = vpop.f32.mrb[2].mxu0 }
 0x11e   :  { %v314_v22 = vpop.f32.mrb[3].mxu0 }
 0x11f   :  { %v315_v23 = vadd.f32 %v314_v22, %v313_v21 }
 0x121   :  { %v292_v24 = vpack.c.bf16 %v315_v23, %v312_v20 }
 0x123   :  { %293 = vst [vmem:[#allocation8] sm:$0xff] %v292_v24  }
 0x124   :  { %397 = shalt.err (!%p394_p6)
}
 0x125   :  { %s398_s12 = scalar_lea.hbm %s480_s2, 128 }
 0x126   :  { %p399_p7 = scmp.ne.s32.totalorder %s480_s2, %s398_s12  ;;  %p402_p8 = scmp.lt.u32.totalorder %s398_s12, %s480_s2 }
 0x128   :  { %p404_p9 = pnand %p402_p8, %p399_p7 }
 0x12a   :  { %407 = shalt.err (!%p404_p9)
}
 0x12b   :  { %260 = dma.vmem_to_hbm [thread:$0]  %s255_s8, 128, %s480_s2, [#allocation5], %s418_s0, %s418_s0, %s419_s5  }
 0x12c   :  { %412 = dma.done.wait [#allocation5], 128  }
 0x12d   :  { %413 = vsyncadd [#allocation5], 4294967168 }
 0x12e   :  { %264 = vsyncpa [#allocation4], 1 }
 0x12f   :  { %265 = vsyncpa [#allocation7], 1 }
 0x130   :  { %266 = vsyncpa [#allocation5], 1 }

</bundles_post_ra>
